<compile_context>
chip_gen: v5e
topology: v5e:2x2
jax: 0.10.0
libtpu: 0.0.40
codegen_flags: <defaults>
</compile_context>

<pallas_src>
import jax
import jax.numpy as jnp
from jax.experimental import pallas as pl
from jax.experimental.pallas import tpu as pltpu

_MIB = 1024 * 1024


def gcn_kernel(adj_ref, sup_ref, b_ref, o_ref, acc_ref):
    """out[i] = sum_k adj[i, k] @ support[k] + bias.

    Grid = (row tiles i, contraction tiles k); acc_ref: [tm, F_out_p] f32.
    """
    k = pl.program_id(1)

    @pl.when(k == 0)
    def _init():
        acc_ref[...] = jnp.zeros_like(acc_ref)

    acc_ref[...] += jnp.dot(
        adj_ref[...], sup_ref[...], preferred_element_type=jnp.float32
    )

    @pl.when(k == pl.num_programs(1) - 1)
    def _finalize():
        o_ref[...] = (acc_ref[...] + b_ref[...]).astype(o_ref.dtype)


def _round_up(x, m):
    return ((x + m - 1) // m) * m


def _pick_tile(dim, pref, align):
    """Largest multiple of `align` that is <= min(pref, dim) and divides `dim`.

    `dim` is always a multiple of 128 here (and 128 % align == 0), so `align`
    itself is a guaranteed fallback.
    """
    t = min(pref, dim)
    t = max((t // align) * align, align)
    while t > align and dim % t != 0:
        t -= align
    return t


def _vmem_capacity_bytes():
    """Per-core VMEM capacity; conservative (v7x) fallback if query fails."""
    try:
        info = pltpu.get_tpu_info()
        cap = getattr(info, "vmem_capacity_bytes", None)
        if cap:
            return int(cap)
    except Exception:
        pass
    return 64 * _MIB


def _buffer_bytes(tm, tk, f_out_p, c_item, out_item):
    adj_b = 2 * tm * tk * c_item            # double-buffered adj tile
    sup_b = 2 * tk * f_out_p * c_item       # double-buffered support block
    out_b = 2 * tm * f_out_p * out_item     # double-buffered output tile
    acc_b = tm * f_out_p * 4                # persistent f32 accumulator
    bias_b = 2 * f_out_p * 4                # (tiny) bias
    return adj_b + sup_b + out_b + acc_b + bias_b


def graph_convolution(x, adj, weight, bias=None, *, tm=512, tk=4096,
                      compute_dtype=jnp.bfloat16, out_dtype=jnp.float32):
    """x: [N, F_in], adj: [N, N] dense, weight: [F_in, F_out], bias: [F_out]|None."""
    N, f_in = x.shape
    f_in_w, f_out = weight.shape
    assert f_in_w == f_in
    assert adj.shape == (N, N)

    # ---- support = x @ W outside the kernel, in f32 (tiny vs. adj @ support).
    support = jnp.dot(x.astype(jnp.float32), weight.astype(jnp.float32))

    # ---- Pad F_out to a multiple of 128 so accumulator/stores are lane-dense.
    f_out_p = _round_up(f_out, 128)
    if f_out_p != f_out:
        support = jnp.pad(support, ((0, 0), (0, f_out_p - f_out)))

    bias2d = jnp.zeros((1, f_out_p), jnp.float32)
    if bias is not None:
        bias2d = bias2d.at[0, :f_out].set(bias.astype(jnp.float32))

    # ---- Pad N to a multiple of 128 (zero rows/cols contribute nothing).
    n_p = _round_up(N, 128)
    adj_c = adj.astype(compute_dtype)
    sup_c = support.astype(compute_dtype)
    if n_p != N:
        adj_c = jnp.pad(adj_c, ((0, n_p - N), (0, n_p - N)))
        sup_c = jnp.pad(sup_c, ((0, n_p - N), (0, 0)))

    c_item = jnp.dtype(compute_dtype).itemsize
    out_item = jnp.dtype(out_dtype).itemsize
    row_align = 8 if c_item >= 4 else 16     # bf16 sublane packing -> 16

    # ---- Tile sizes, shrunk to fit a generation-derived VMEM budget.
    vmem_cap = _vmem_capacity_bytes()
    vmem_limit = max(vmem_cap - 16 * _MIB, 32 * _MIB)       # scoped limit
    tile_budget = max(vmem_limit - 16 * _MIB, 16 * _MIB)    # our buffers

    tm = _pick_tile(n_p, tm, row_align)
    tk = _pick_tile(n_p, tk, 128)
    while _buffer_bytes(tm, tk, f_out_p, c_item, out_item) > tile_budget and tk > 128:
        tk = _pick_tile(n_p, max(tk // 2, 128), 128)
    while _buffer_bytes(tm, tk, f_out_p, c_item, out_item) > tile_budget and tm > row_align:
        tm = _pick_tile(n_p, max(tm // 2, row_align), row_align)

    grid = (n_p // tm, n_p // tk)

    out = pl.pallas_call(
        gcn_kernel,
        out_shape=jax.ShapeDtypeStruct((n_p, f_out_p), out_dtype),
        grid_spec=pltpu.PrefetchScalarGridSpec(
            num_scalar_prefetch=0,
            grid=grid,
            in_specs=[
                pl.BlockSpec((tm, tk), lambda i, k: (i, k)),        # adj tile (streamed)
                pl.BlockSpec((tk, f_out_p), lambda i, k: (k, 0)),   # support block
                pl.BlockSpec((1, f_out_p), lambda i, k: (0, 0)),    # bias (resident)
            ],
            out_specs=pl.BlockSpec((tm, f_out_p), lambda i, k: (i, 0)),
            scratch_shapes=[pltpu.VMEM((tm, f_out_p), jnp.float32)],
        ),
        compiler_params=pltpu.CompilerParams(
            dimension_semantics=("parallel", "arbitrary"),
            vmem_limit_bytes=int(vmem_limit),
        ),
    )(adj_c, sup_c, bias2d)

    if n_p != N or f_out_p != f_out:
        out = out[:N, :f_out]
    return out


def reference(x, adj, weight, bias=None):
    support = x @ weight
    out = adj @ support
    if bias is not None:
        out = out + bias[None, :]
    return out


if __name__ == "__main__":
    key = jax.random.PRNGKey(0)
    k_x, k_adj, k_w, k_x2, k_adj2, k_w2 = jax.random.split(key, 6)

    # ---- Case 1: aligned shapes (N=64 nodes, F_in=32, F_out=128).
    N, f_in, f_out = 64, 32, 128
    x = jax.random.normal(k_x, (N, f_in), dtype=jnp.float32)
    adj = jax.random.uniform(k_adj, (N, N), dtype=jnp.float32)
    adj = adj / jnp.sum(adj, axis=1, keepdims=True)      # row-normalized GCN adj
    std = (2.0 / (f_in + f_out)) ** 0.5                  # xavier_normal_
    weight = std * jax.random.normal(k_w, (f_in, f_out), dtype=jnp.float32)
    bias = jnp.zeros((f_out,), dtype=jnp.float32)

    ref = reference(x, adj, weight, bias)
    out_f32 = jax.block_until_ready(
        graph_convolution(x, adj, weight, bias, compute_dtype=jnp.float32))
    assert out_f32.shape == (N, f_out)
    assert jnp.allclose(out_f32, ref, atol=1e-4, rtol=1e-4), "f32 mismatch (case 1)"

    out_bf16 = jax.block_until_ready(graph_convolution(x, adj, weight, bias))
    assert out_bf16.shape == (N, f_out)
    assert jnp.allclose(out_bf16, ref, atol=3e-2, rtol=3e-2), "bf16 mismatch (case 1)"

    # ---- Case 2: awkward shapes exercise the N / F_out zero-padding path.
    N2, f_in2, f_out2 = 100, 24, 50
    x2 = jax.random.normal(k_x2, (N2, f_in2), dtype=jnp.float32)
    adj2 = jax.random.uniform(k_adj2, (N2, N2), dtype=jnp.float32)
    adj2 = adj2 / jnp.sum(adj2, axis=1, keepdims=True)
    std2 = (2.0 / (f_in2 + f_out2)) ** 0.5
    weight2 = std2 * jax.random.normal(k_w2, (f_in2, f_out2), dtype=jnp.float32)
    bias2 = jnp.zeros((f_out2,), dtype=jnp.float32)

    ref2 = reference(x2, adj2, weight2, bias2)
    out2 = jax.block_until_ready(
        graph_convolution(x2, adj2, weight2, bias2, compute_dtype=jnp.float32))
    assert out2.shape == (N2, f_out2)
    assert jnp.allclose(out2, ref2, atol=1e-4, rtol=1e-4), "f32 mismatch (case 2)"

    # ---- No-bias path (matches the bias=False branch of the module).
    ref_nb = reference(x2, adj2, weight2, None)
    out_nb = jax.block_until_ready(
        graph_convolution(x2, adj2, weight2, None, compute_dtype=jnp.float32))
    assert jnp.allclose(out_nb, ref_nb, atol=1e-4, rtol=1e-4), "no-bias mismatch"

    print("KERNEL_OK")
</pallas_src>

<mosaic_0001>
module attributes {stable_mosaic.version = 11 : i64} {
  func.func @gcn_kernel(%arg0: i32, %arg1: i32, %arg2: memref<128x128xf32, #tpu.memory_space<vmem>>, %arg3: memref<128x128xf32, #tpu.memory_space<vmem>>, %arg4: memref<1x128xf32, #tpu.memory_space<vmem>>, %arg5: memref<128x128xf32, #tpu.memory_space<vmem>>, %arg6: memref<128x128xf32, #tpu.memory_space<vmem>>) attributes {dimension_semantics = [#tpu.dimension_semantics<parallel>, #tpu.dimension_semantics<arbitrary>], iteration_bounds = array<i64: 1, 1>, scalar_prefetch = 0 : i64, scratch_operands = 1 : i64, tpu.core_type = #tpu.core_type<tc>, window_params = [{transform_indices = @transform_0, window_bounds = array<i64: 128, 128>}, {transform_indices = @transform_1, window_bounds = array<i64: 128, 128>}, {pipeline_mode = #tpu.pipeline_mode<synchronous>, transform_indices = @transform_2, window_bounds = array<i64: 1, 128>}, {transform_indices = @transform_3, window_bounds = array<i64: 128, 128>}]} {
    %c0_i32 = arith.constant 0 : i32
    %0 = arith.cmpi eq, %arg1, %c0_i32 : i32
    %1 = arith.extui %0 : i1 to i32
    %c0_i32_0 = arith.constant 0 : i32
    %2 = arith.cmpi ne, %1, %c0_i32_0 : i32
    scf.if %2 {
      %cst_10 = arith.constant 0.000000e+00 : f32
      %12 = vector.broadcast %cst_10 : f32 to vector<128x128xf32>
      %c0_11 = arith.constant 0 : index
      %c0_12 = arith.constant 0 : index
      %13 = vector.load %arg6[%c0_11, %c0_12] : memref<128x128xf32, #tpu.memory_space<vmem>>, vector<128x128xf32>
      tpu.vector_store %arg6[%c0_11, %c0_12], %12 {strides = array<i32>} : memref<128x128xf32, #tpu.memory_space<vmem>>, vector<128x128xf32>,
    } else {
    }
    %c0 = arith.constant 0 : index
    %c0_1 = arith.constant 0 : index
    %3 = vector.load %arg6[%c0, %c0_1] : memref<128x128xf32, #tpu.memory_space<vmem>>, vector<128x128xf32>
    %c0_2 = arith.constant 0 : index
    %c0_3 = arith.constant 0 : index
    %4 = vector.load %arg2[%c0_2, %c0_3] : memref<128x128xf32, #tpu.memory_space<vmem>>, vector<128x128xf32>
    %c0_4 = arith.constant 0 : index
    %c0_5 = arith.constant 0 : index
    %5 = vector.load %arg3[%c0_4, %c0_5] : memref<128x128xf32, #tpu.memory_space<vmem>>, vector<128x128xf32>
    %cst = arith.constant dense<0.000000e+00> : vector<128x128xf32>
    %6 = tpu.matmul %4, %5, %cst {dimension_numbers = #tpu.dot_dimension_numbers<[1], [0], [0], [1], [0, 0, 1, 1], [], []>} : vector<128x128xf32>, vector<128x128xf32>, vector<128x128xf32> -> vector<128x128xf32>
    %7 = arith.addf %3, %6 : vector<128x128xf32>
    %c0_6 = arith.constant 0 : index
    %c0_7 = arith.constant 0 : index
    %8 = vector.load %arg6[%c0_6, %c0_7] : memref<128x128xf32, #tpu.memory_space<vmem>>, vector<128x128xf32>
    tpu.vector_store %arg6[%c0_6, %c0_7], %7 {strides = array<i32>} : memref<128x128xf32, #tpu.memory_space<vmem>>, vector<128x128xf32>,
    %c0_i32_8 = arith.constant 0 : i32
    %9 = arith.cmpi eq, %arg1, %c0_i32_8 : i32
    %10 = arith.extui %9 : i1 to i32
    %c0_i32_9 = arith.constant 0 : i32
    %11 = arith.cmpi ne, %10, %c0_i32_9 : i32
    scf.if %11 {
      %c0_10 = arith.constant 0 : index
      %c0_11 = arith.constant 0 : index
      %12 = vector.load %arg6[%c0_10, %c0_11] : memref<128x128xf32, #tpu.memory_space<vmem>>, vector<128x128xf32>
      %c0_12 = arith.constant 0 : index
      %c0_13 = arith.constant 0 : index
      %13 = vector.load %arg4[%c0_12, %c0_13] : memref<1x128xf32, #tpu.memory_space<vmem>>, vector<1x128xf32>
      %14 = vector.broadcast %13 : vector<1x128xf32> to vector<128x128xf32>
      %15 = arith.addf %12, %14 : vector<128x128xf32>
      %c0_14 = arith.constant 0 : index
      %c0_15 = arith.constant 0 : index
      %16 = vector.load %arg5[%c0_14, %c0_15] : memref<128x128xf32, #tpu.memory_space<vmem>>, vector<128x128xf32>
      tpu.vector_store %arg5[%c0_14, %c0_15], %15 {strides = array<i32>} : memref<128x128xf32, #tpu.memory_space<vmem>>, vector<128x128xf32>,
    } else {
    }
    return
  }
  func.func @transform_0(%arg0: i32, %arg1: i32) -> (i32, i32) {
    %c0_i32 = arith.constant 0 : i32
    return %arg0, %arg1 : i32, i32
  }
  func.func @transform_1(%arg0: i32, %arg1: i32) -> (i32, i32) {
    %c0_i32 = arith.constant 0 : i32
    %c0_i32_0 = arith.constant 0 : i32
    return %arg1, %c0_i32 : i32, i32
  }
  func.func @transform_2(%arg0: i32, %arg1: i32) -> (i32, i32) {
    %c0_i32 = arith.constant 0 : i32
    %c0_i32_0 = arith.constant 0 : i32
    %c0_i32_1 = arith.constant 0 : i32
    return %c0_i32, %c0_i32_0 : i32, i32
  }
  func.func @transform_3(%arg0: i32, %arg1: i32) -> (i32, i32) {
    %c0_i32 = arith.constant 0 : i32
    %c0_i32_0 = arith.constant 0 : i32
    return %arg0, %c0_i32 : i32, i32
  }
}

</mosaic_0001>

<bundles_post_ra>
// kernel: tpu_custom_call.1
= control target key start
LH: loop header
LB: loop body
LE: loop exit
PB: predicated region body
PF: predicated region fallthrough
CT: control target
= control target key end

     0   :  { %8 = vsyncpa [#allocation4], 0  ;;  %s465_s0 = inlined_call_operand.hbm [shape: f32[128,128], index: 0, kind: input, shape index: {}]   ;;  %s466_s1 = inlined_call_operand.hbm [shape: f32[128,128], index: 1, kind: input, shape index: {}]   ;;  %s467_s2 = inlined_call_operand.vmem [shape: f32[1,128], index: 2, kind: input, shape index: {}]   ;;  %s468_s3 = inlined_call_operand.hbm [shape: f32[128,128], index: 3, kind: output, shape index: {}]  }
   0x1   :  { %9 = vsyncpa [#allocation7], 0 }
   0x2   :  { %10 = vsyncpa [#allocation5], 0  ;;  %s15_s14 = sshll.u32 %s465_s0, 4  ;;  %s419_s15 = smov [#allocation3]   ;;  %s16_s14 = int_to_ptr.hbm [resolvable:$true] %s15_s14 }
   0x3   :  { %s17_s16 = sshll.u32 %s419_s15, 4  ;;  %s28_s19 = sshll.u32 %s466_s1, 4  ;;  %s18_s16 = int_to_ptr.vmem [resolvable:$true] %s17_s16  ;;  %s29_s19 = int_to_ptr.hbm [resolvable:$true] %s28_s19 }
   0x4   :  { %s420_s20 = smov 128   ;;  %s421_s21 = smov 8  }
   0x5   :  { %23 = dma.hbm_to_vmem [thread:$0]  %s16_s14, 2048, %s18_s16, [#allocation4], %s420_s20, %s420_s20, %s421_s21  }
   0x6   :  { %s422_s22 = smov [#allocation6]  }
   0x7   :  { %s30_s23 = sshll.u32 %s422_s22, 4  ;;  %s31_s23 = int_to_ptr.vmem [resolvable:$true] %s30_s23 }
   0x8   :  { %36 = dma.hbm_to_vmem [thread:$0]  %s29_s19, 2048, %s31_s23, [#allocation7], %s420_s20, %s420_s20, %s421_s21  }
   0x9   :  { %413 = dma.done.wait [#allocation4], 2048  }
   0xa   :  { %414 = vsyncadd [#allocation4], 4294965248 }
   0xb   :  { %415 = dma.done.wait [#allocation7], 2048  }
   0xc   :  { %416 = vsyncadd [#allocation7], 4294965248  ;;  %v114_v0 = vld [vmem:[#allocation6 + $0x78] sm:$0xff]  ;;  %v113_v1 = vld [vmem:[#allocation6 + $0x70] sm:$0xff]  ;;  %s273_s27 = sshll.u32 %s468_s3, 4  ;;  %s274_s27 = int_to_ptr.hbm [resolvable:$true] %s273_s27 }
   0xd   :  { %288 = vmatpush.msra.mxu2 %v114_v0  ;;  %289 = vmatpush.msra.mxu3 %v114_v0  ;;  %v112_v2 = vld [vmem:[#allocation6 + $0x68] sm:$0xff]  ;;  %v111_v3 = vld [vmem:[#allocation6 + $0x60] sm:$0xff]  ;;  %v110_v4 = vld [vmem:[#allocation6 + $0x58] sm:$0xff] }
   0xe   :  { %115 = vmatpush.msra.mxu0 %v114_v0  ;;  %287 = vmatpush.msra.mxu1 %v114_v0  ;;  %v109_v5 = vld [vmem:[#allocation6 + $0x50] sm:$0xff]  ;;  %v108_v6 = vld [vmem:[#allocation6 + $0x48] sm:$0xff]  ;;  %v107_v7 = vld [vmem:[#allocation6 + $0x40] sm:$0xff] }
   0xf   :  { %291 = vmatpush.msra.mxu2 %v113_v1  ;;  %292 = vmatpush.msra.mxu3 %v113_v1  ;;  %v106_v8 = vld [vmem:[#allocation6 + $0x38] sm:$0xff]  ;;  %v105_v9 = vld [vmem:[#allocation6 + $0x30] sm:$0xff]  ;;  %v104_v10 = vld [vmem:[#allocation6 + $0x28] sm:$0xff] }
  0x10   :  { %116 = vmatpush.msra.mxu0 %v113_v1  ;;  %290 = vmatpush.msra.mxu1 %v113_v1  ;;  %v103_v11 = vld [vmem:[#allocation6 + $0x20] sm:$0xff]  ;;  %v102_v12 = vld [vmem:[#allocation6 + $0x18] sm:$0xff]  ;;  %v101_v13 = vld [vmem:[#allocation6 + $0x10] sm:$0xff] }
  0x11   :  { %294 = vmatpush.msra.mxu2 %v112_v2  ;;  %295 = vmatpush.msra.mxu3 %v112_v2  ;;  %v100_v14 = vld [vmem:[#allocation6 + $0x8] sm:$0xff]  ;;  %v99_v15 = vld [vmem:[#allocation6] sm:$0xff]  ;;  %v93_v24 = vld [vmem:[#allocation3 + $0x50] sm:$0xff] }
  0x12   :  { %117 = vmatpush.msra.mxu0 %v112_v2  ;;  %293 = vmatpush.msra.mxu1 %v112_v2  ;;  %v91_v16 = vld [vmem:[#allocation3 + $0x40] sm:$0xff]  ;;  %v92_v20 = vld [vmem:[#allocation3 + $0x48] sm:$0xff]  ;;  %v97_v25 = vld [vmem:[#allocation3 + $0x70] sm:$0xff] }
  0x13   :  { %297 = vmatpush.msra.mxu2 %v111_v3  ;;  %298 = vmatpush.msra.mxu3 %v111_v3  ;;  %v95_v17 = vld [vmem:[#allocation3 + $0x60] sm:$0xff]  ;;  %v96_v21 = vld [vmem:[#allocation3 + $0x68] sm:$0xff]  ;;  %v85_v26 = vld [vmem:[#allocation3 + $0x10] sm:$0xff] }
  0x14   :  { %118 = vmatpush.msra.mxu0 %v111_v3  ;;  %296 = vmatpush.msra.mxu1 %v111_v3  ;;  %v83_v18 = vld [vmem:[#allocation3] sm:$0xff]  ;;  %v84_v22 = vld [vmem:[#allocation3 + $0x8] sm:$0xff]  ;;  %v89_v27 = vld [vmem:[#allocation3 + $0x30] sm:$0xff] }
  0x15   :  { %300 = vmatpush.msra.mxu2 %v110_v4  ;;  %301 = vmatpush.msra.mxu3 %v110_v4  ;;  %v87_v19 = vld [vmem:[#allocation3 + $0x20] sm:$0xff]  ;;  %v88_v23 = vld [vmem:[#allocation3 + $0x28] sm:$0xff]  ;;  %v94_v28 = vld [vmem:[#allocation3 + $0x58] sm:$0xff] }
  0x16   :  { %119 = vmatpush.msra.mxu0 %v110_v4  ;;  %299 = vmatpush.msra.mxu1 %v110_v4  ;;  %v98_v29 = vld [vmem:[#allocation3 + $0x78] sm:$0xff]  ;;  %v340_v32 = vld [vmem:[%s467_s2] ss:$0 sm:$0xff]  ;;  %s423_s2 = smov [#allocation8]  }
  0x17   :  { %303 = vmatpush.msra.mxu2 %v109_v5  ;;  %304 = vmatpush.msra.mxu3 %v109_v5  ;;  %v86_v30 = vld [vmem:[#allocation3 + $0x18] sm:$0xff]  ;;  %s271_s24 = sshll.u32 %s423_s2, 4  ;;  %s272_s24 = int_to_ptr.vmem [resolvable:$true] %s271_s24 }
  0x18   :  { %120 = vmatpush.msra.mxu0 %v109_v5  ;;  %302 = vmatpush.msra.mxu1 %v109_v5  ;;  %v90_v31 = vld [vmem:[#allocation3 + $0x38] sm:$0xff] }
  0x19   :  { %306 = vmatpush.msra.mxu2 %v108_v6  ;;  %307 = vmatpush.msra.mxu3 %v108_v6 }
  0x1a   :  { %121 = vmatpush.msra.mxu0 %v108_v6  ;;  %305 = vmatpush.msra.mxu1 %v108_v6 }
  0x1b   :  { %309 = vmatpush.msra.mxu2 %v107_v7  ;;  %310 = vmatpush.msra.mxu3 %v107_v7 }
  0x1c   :  { %122 = vmatpush.msra.mxu0 %v107_v7  ;;  %308 = vmatpush.msra.mxu1 %v107_v7 }
  0x1d   :  { %312 = vmatpush.msra.mxu2 %v106_v8  ;;  %313 = vmatpush.msra.mxu3 %v106_v8 }
  0x1e   :  { %123 = vmatpush.msra.mxu0 %v106_v8  ;;  %311 = vmatpush.msra.mxu1 %v106_v8 }
  0x1f   :  { %315 = vmatpush.msra.mxu2 %v105_v9  ;;  %316 = vmatpush.msra.mxu3 %v105_v9 }
  0x20   :  { %124 = vmatpush.msra.mxu0 %v105_v9  ;;  %314 = vmatpush.msra.mxu1 %v105_v9 }
  0x21   :  { %318 = vmatpush.msra.mxu2 %v104_v10  ;;  %319 = vmatpush.msra.mxu3 %v104_v10 }
  0x22   :  { %125 = vmatpush.msra.mxu0 %v104_v10  ;;  %317 = vmatpush.msra.mxu1 %v104_v10 }
  0x23   :  { %321 = vmatpush.msra.mxu2 %v103_v11  ;;  %322 = vmatpush.msra.mxu3 %v103_v11 }
  0x24   :  { %126 = vmatpush.msra.mxu0 %v103_v11  ;;  %320 = vmatpush.msra.mxu1 %v103_v11 }
  0x25   :  { %324 = vmatpush.msra.mxu2 %v102_v12  ;;  %325 = vmatpush.msra.mxu3 %v102_v12 }
  0x26   :  { %127 = vmatpush.msra.mxu0 %v102_v12  ;;  %323 = vmatpush.msra.mxu1 %v102_v12 }
  0x27   :  { %327 = vmatpush.msra.mxu2 %v101_v13  ;;  %328 = vmatpush.msra.mxu3 %v101_v13 }
  0x28   :  { %128 = vmatpush.msra.mxu0 %v101_v13  ;;  %326 = vmatpush.msra.mxu1 %v101_v13 }
  0x29   :  { %330 = vmatpush.msra.mxu2 %v100_v14  ;;  %331 = vmatpush.msra.mxu3 %v100_v14 }
  0x2a   :  { %129 = vmatpush.msra.mxu0 %v100_v14  ;;  %329 = vmatpush.msra.mxu1 %v100_v14 }
  0x2b   :  { %333 = vmatpush.msra.mxu2 %v99_v15  ;;  %334 = vmatpush.msra.mxu3 %v99_v15 }
  0x2c   :  { %155 = vmatmul.f32.vlgmr.msra.gmra.mxu2 %v91_v16  ;;  %167 = vmatmul.f32.vlgmr.msra.gmra.mxu3 %v95_v17 }
  0x2d   :  { %130 = vmatpush.msra.mxu0 %v99_v15  ;;  %332 = vmatpush.msra.mxu1 %v99_v15 }
  0x2e   :  { %131 = vmatmul.f32.vlgmr.msra.gmra.mxu0 %v83_v18  ;;  %143 = vmatmul.f32.vlgmr.msra.gmra.mxu1 %v87_v19 }
  0x34   :  { %158 = vmatmul.f32.gmra.mxu2 %v92_v20  ;;  %170 = vmatmul.f32.gmra.mxu3 %v96_v21 }
  0x36   :  { %134 = vmatmul.f32.gmra.mxu0 %v84_v22  ;;  %146 = vmatmul.f32.gmra.mxu1 %v88_v23 }
  0x3c   :  { %161 = vmatmul.f32.gmra.mxu2 %v93_v24  ;;  %173 = vmatmul.f32.gmra.mxu3 %v97_v25 }
  0x3e   :  { %137 = vmatmul.f32.gmra.mxu0 %v85_v26  ;;  %149 = vmatmul.f32.gmra.mxu1 %v89_v27 }
  0x44   :  { %164 = vmatmul.f32.gmra.mxu2 %v94_v28  ;;  %176 = vmatmul.f32.gmra.mxu3 %v98_v29 }
  0x46   :  { %140 = vmatmul.f32.gmra.mxu0 %v86_v30  ;;  %152 = vmatmul.f32.gmra.mxu1 %v90_v31 }
  0xab   :  { %v132_v33 = vpop.f32.mrf.mxu0  ;;  %v144_v34 = vpop.f32.mrf.mxu1 }
  0xac   :  { %v235_v35 = vadd.f32 %v340_v32, %v132_v33  ;;  %v239_v36 = vadd.f32 %v340_v32, %v144_v34 }
  0xae   :  { %251 = vst [vmem:[#allocation8] sm:$0xff] %v235_v35 }
  0xaf   :  { %255 = vst [vmem:[#allocation8 + $0x20] sm:$0xff] %v239_v36  ;;  %v156_v37 = vpop.f32.mrf.mxu2  ;;  %v168_v38 = vpop.f32.mrf.mxu3 }
  0xb0   :  { %v243_v39 = vadd.f32 %v340_v32, %v156_v37  ;;  %v247_v40 = vadd.f32 %v340_v32, %v168_v38 }
  0xb2   :  { %259 = vst [vmem:[#allocation8 + $0x40] sm:$0xff] %v243_v39 }
  0xb3   :  { %263 = vst [vmem:[#allocation8 + $0x60] sm:$0xff] %v247_v40  ;;  %v135_v41 = vpop.f32.mrf.mxu0  ;;  %v147_v42 = vpop.f32.mrf.mxu1 }
  0xb4   :  { %v236_v43 = vadd.f32 %v340_v32, %v135_v41  ;;  %v240_v44 = vadd.f32 %v340_v32, %v147_v42 }
  0xb6   :  { %252 = vst [vmem:[#allocation8 + $0x8] sm:$0xff] %v236_v43 }
  0xb7   :  { %256 = vst [vmem:[#allocation8 + $0x28] sm:$0xff] %v240_v44  ;;  %v159_v45 = vpop.f32.mrf.mxu2  ;;  %v171_v46 = vpop.f32.mrf.mxu3 }
  0xb8   :  { %v244_v47 = vadd.f32 %v340_v32, %v159_v45  ;;  %v248_v48 = vadd.f32 %v340_v32, %v171_v46 }
  0xba   :  { %260 = vst [vmem:[#allocation8 + $0x48] sm:$0xff] %v244_v47 }
  0xbb   :  { %264 = vst [vmem:[#allocation8 + $0x68] sm:$0xff] %v248_v48  ;;  %v138_v49 = vpop.f32.mrf.mxu0  ;;  %v150_v50 = vpop.f32.mrf.mxu1 }
  0xbc   :  { %v237_v51 = vadd.f32 %v340_v32, %v138_v49  ;;  %v241_v52 = vadd.f32 %v340_v32, %v150_v50 }
  0xbe   :  { %253 = vst [vmem:[#allocation8 + $0x10] sm:$0xff] %v237_v51 }
  0xbf   :  { %257 = vst [vmem:[#allocation8 + $0x30] sm:$0xff] %v241_v52  ;;  %v162_v53 = vpop.f32.mrf.mxu2  ;;  %v174_v54 = vpop.f32.mrf.mxu3 }
  0xc0   :  { %v245_v55 = vadd.f32 %v340_v32, %v162_v53  ;;  %v249_v56 = vadd.f32 %v340_v32, %v174_v54 }
  0xc2   :  { %261 = vst [vmem:[#allocation8 + $0x50] sm:$0xff] %v245_v55 }
  0xc3   :  { %265 = vst [vmem:[#allocation8 + $0x70] sm:$0xff] %v249_v56  ;;  %v141_v57 = vpop.f32.mrf.mxu0  ;;  %v153_v58 = vpop.f32.mrf.mxu1 }
  0xc4   :  { %v238_v59 = vadd.f32 %v340_v32, %v141_v57  ;;  %v242_v60 = vadd.f32 %v340_v32, %v153_v58 }
  0xc6   :  { %254 = vst [vmem:[#allocation8 + $0x18] sm:$0xff] %v238_v59 }
  0xc7   :  { %258 = vst [vmem:[#allocation8 + $0x38] sm:$0xff] %v242_v60  ;;  %v165_v61 = vpop.f32.mrf.mxu2  ;;  %v177_v62 = vpop.f32.mrf.mxu3 }
  0xc8   :  { %v246_v63 = vadd.f32 %v340_v32, %v165_v61  ;;  %v250_v0 = vadd.f32 %v340_v32, %v177_v62 }
  0xca   :  { %262 = vst [vmem:[#allocation8 + $0x58] sm:$0xff] %v246_v63 }
  0xcb   :  { %266 = vst [vmem:[#allocation8 + $0x78] sm:$0xff] %v250_v0 }
  0xcc   :  { %279 = dma.vmem_to_hbm [thread:$0]  %s272_s24, 2048, %s274_s27, [#allocation5], %s420_s20, %s420_s20, %s421_s21  }
  0xcd   :  { %417 = dma.done.wait [#allocation5], 2048  }
  0xce   :  { %418 = vsyncadd [#allocation5], 4294965248 }
  0xcf   :  { %284 = vsyncpa [#allocation4], 1 }
  0xd0   :  { %285 = vsyncpa [#allocation7], 1 }
  0xd1   :  { %286 = vsyncpa [#allocation5], 1 }

</bundles_post_ra>
